<compile_context>
chip_gen: v7x
topology: tpu7x:2x2x1
jax: 0.10.0
libtpu: 0.0.40
codegen_flags: <defaults>
</compile_context>

<pallas_src>
import jax
import jax.numpy as jnp
from jax.experimental import pallas as pl
from jax.experimental.pallas import tpu as pltpu

# ---------------------------------------------------------------------------
# Model dimensions (small, consistent with the module's forward contract).
# ---------------------------------------------------------------------------
LATENT_M = 32            # latent dimension M
HIDDEN = 128             # decoder hidden width
IMG_H, IMG_W = 28, 28    # output spatial dims (matches self.std shape)
OUT_DIM = IMG_H * IMG_W  # 784
OUT_PAD = 7 * 128        # 896, lane-dense padded output width
MAX_BLOCK_B = 256        # batch tile (multiple of 256 keeps v6e/v7x MXU full)


def _round_up(x, m):
    return ((x + m - 1) // m) * m


# ---------------------------------------------------------------------------
# Pallas kernel: fused 3-layer MLP decoder (bf16 matmuls, f32 elementwise).
# ---------------------------------------------------------------------------
def _make_decoder_kernel(emit_probs):
    def kernel(z_ref, w1_ref, b1_ref, w2_ref, b2_ref, w3_ref, b3_ref,
               *out_refs):
        z = z_ref[...]                                             # (TB, M) bf16
        h1 = jnp.dot(z, w1_ref[...], preferred_element_type=jnp.float32)
        h1 = jnp.maximum(h1 + b1_ref[...], 0.0)                    # f32
        h2 = jnp.dot(h1.astype(jnp.bfloat16), w2_ref[...],
                     preferred_element_type=jnp.float32)
        h2 = jnp.maximum(h2 + b2_ref[...], 0.0)                    # f32
        logits = jnp.dot(h2.astype(jnp.bfloat16), w3_ref[...],
                         preferred_element_type=jnp.float32) + b3_ref[...]
        out_refs[0][...] = logits                                  # (TB, 896) f32
        if emit_probs:
            # ContinuousBernoulli `probs` parameter (sigmoid of logits); the
            # distribution wrapper itself is not a numeric op.
            out_refs[1][...] = jax.nn.sigmoid(logits)
    return kernel


def bernoulli_decoder_forward(z, params, *, emit_probs=True,
                              block_b=MAX_BLOCK_B):
    """Returns (logits, probs), each shaped (B, 1, 28, 28).

    If emit_probs is False, returns (logits, None) and skips the second
    output writeback entirely.
    """
    B, M = z.shape
    assert M == LATENT_M

    TB = min(block_b, _round_up(B, 8))
    B_pad = _round_up(B, TB)

    z_pad = jnp.zeros((B_pad, M), jnp.bfloat16).at[:B, :].set(
        z.astype(jnp.bfloat16))

    w1, b1, w2, b2, w3, b3 = (params[k] for k in
                              ("w1", "b1", "w2", "b2", "w3", "b3"))

    def resident(shape):  # weights/biases stay VMEM-resident across the grid
        return pl.BlockSpec(shape, lambda i: (0, 0))

    in_specs = [
        pl.BlockSpec((TB, LATENT_M), lambda i: (i, 0)),   # z tile
        resident((LATENT_M, HIDDEN)),                     # w1
        resident((1, HIDDEN)),                            # b1
        resident((HIDDEN, HIDDEN)),                       # w2
        resident((1, HIDDEN)),                            # b2
        resident((HIDDEN, OUT_PAD)),                      # w3 (896-padded)
        resident((1, OUT_PAD)),                           # b3 (896-padded)
    ]
    out_spec = pl.BlockSpec((TB, OUT_PAD), lambda i: (i, 0))
    out_struct = jax.ShapeDtypeStruct((B_pad, OUT_PAD), jnp.float32)

    if emit_probs:
        out_shape = (out_struct, out_struct)
        out_specs = (out_spec, out_spec)
    else:
        out_shape = out_struct
        out_specs = out_spec

    result = pl.pallas_call(
        _make_decoder_kernel(emit_probs),
        grid=(B_pad // TB,),
        in_specs=in_specs,
        out_specs=out_specs,
        out_shape=out_shape,
        compiler_params=pltpu.CompilerParams(
            dimension_semantics=("parallel",),   # megacore split on v7x
            vmem_limit_bytes=64 << 20,
        ),
    )(z_pad, w1, b1, w2, b2, w3, b3)

    def unpad(x):
        # Drop batch padding and the 896->784 lane padding, then unflatten to
        # (B, 1, 28, 28): the 3 event dims of td.Independent(..., 3).
        return x[:B, :OUT_DIM].reshape(B, 1, IMG_H, IMG_W)

    if emit_probs:
        logits_flat, probs_flat = result
        return unpad(logits_flat), unpad(probs_flat)
    return unpad(result), None


# ---------------------------------------------------------------------------
# Deterministic parameter initialization (synthetic weights, no checkpoint).
# Weights stored bf16 (MXU operands), biases f32; w3/b3 zero-padded to 896.
# ---------------------------------------------------------------------------
def init_params(key):
    k1, k2, k3 = jax.random.split(key, 3)
    s1 = 1.0 / jnp.sqrt(LATENT_M)
    s2 = 1.0 / jnp.sqrt(HIDDEN)
    w3_f32 = jnp.zeros((HIDDEN, OUT_PAD), jnp.float32)
    w3_f32 = w3_f32.at[:, :OUT_DIM].set(
        jax.random.normal(k3, (HIDDEN, OUT_DIM), jnp.float32) * s2)
    params = {
        "w1": (jax.random.normal(k1, (LATENT_M, HIDDEN), jnp.float32)
               * s1).astype(jnp.bfloat16),
        "b1": jnp.zeros((1, HIDDEN), jnp.float32),
        "w2": (jax.random.normal(k2, (HIDDEN, HIDDEN), jnp.float32)
               * s2).astype(jnp.bfloat16),
        "b2": jnp.zeros((1, HIDDEN), jnp.float32),
        "w3": w3_f32.astype(jnp.bfloat16),
        "b3": jnp.zeros((1, OUT_PAD), jnp.float32),
        # Unused-in-forward parameter of the module (kept for parity).
        "std": jnp.ones((IMG_H, IMG_W), jnp.float32) * 0.5,
    }
    return params


if __name__ == "__main__":
    key = jax.random.PRNGKey(0)
    pkey, zkey = jax.random.split(key)
    params = init_params(pkey)

    B = 8
    z = jax.random.normal(zkey, (B, LATENT_M), jnp.float32)

    logits, probs = bernoulli_decoder_forward(z, params)
    jax.block_until_ready((logits, probs))

    # Pure-JAX reference with identical bf16 matmul operands / f32 accumulation.
    zb = z.astype(jnp.bfloat16)
    h1 = jnp.maximum(
        jnp.dot(zb, params["w1"], preferred_element_type=jnp.float32)
        + params["b1"], 0.0)
    h2 = jnp.maximum(
        jnp.dot(h1.astype(jnp.bfloat16), params["w2"],
                preferred_element_type=jnp.float32) + params["b2"], 0.0)
    ref_flat = (jnp.dot(h2.astype(jnp.bfloat16), params["w3"],
                        preferred_element_type=jnp.float32) + params["b3"])
    ref_logits = ref_flat[:, :OUT_DIM].reshape(B, 1, IMG_H, IMG_W)

    assert logits.shape == (B, 1, IMG_H, IMG_W)
    assert probs.shape == (B, 1, IMG_H, IMG_W)
    assert jnp.allclose(logits, ref_logits, atol=1e-3, rtol=1e-3)
    assert jnp.allclose(probs, jax.nn.sigmoid(ref_logits), atol=1e-3)

    # TODO(synk): td.Independent(td.ContinuousBernoulli(logits=...), 3) is a
    # lazy distribution object (log_prob/sample machinery), not a forward
    # numeric op; only its parameters (logits / sigmoid(logits)) are computed.
    print("KERNEL_OK")
</pallas_src>

<mosaic_0001>
module attributes {stable_mosaic.version = 11 : i64} {
  func.func @kernel(%arg0: i32, %arg1: memref<8x32xbf16, #tpu.memory_space<vmem>>, %arg2: memref<32x128xbf16, #tpu.memory_space<vmem>>, %arg3: memref<1x128xf32, #tpu.memory_space<vmem>>, %arg4: memref<128x128xbf16, #tpu.memory_space<vmem>>, %arg5: memref<1x128xf32, #tpu.memory_space<vmem>>, %arg6: memref<128x896xbf16, #tpu.memory_space<vmem>>, %arg7: memref<1x896xf32, #tpu.memory_space<vmem>>, %arg8: memref<8x896xf32, #tpu.memory_space<vmem>>, %arg9: memref<8x896xf32, #tpu.memory_space<vmem>>) attributes {dimension_semantics = [#tpu.dimension_semantics<parallel>], iteration_bounds = array<i64: 1>, scalar_prefetch = 0 : i64, scratch_operands = 0 : i64, tpu.core_type = #tpu.core_type<tc>, window_params = [{transform_indices = @transform_0, window_bounds = array<i64: 8, 32>}, {pipeline_mode = #tpu.pipeline_mode<synchronous>, transform_indices = @transform_1, window_bounds = array<i64: 32, 128>}, {pipeline_mode = #tpu.pipeline_mode<synchronous>, transform_indices = @transform_2, window_bounds = array<i64: 1, 128>}, {pipeline_mode = #tpu.pipeline_mode<synchronous>, transform_indices = @transform_3, window_bounds = array<i64: 128, 128>}, {pipeline_mode = #tpu.pipeline_mode<synchronous>, transform_indices = @transform_4, window_bounds = array<i64: 1, 128>}, {pipeline_mode = #tpu.pipeline_mode<synchronous>, transform_indices = @transform_5, window_bounds = array<i64: 128, 896>}, {pipeline_mode = #tpu.pipeline_mode<synchronous>, transform_indices = @transform_6, window_bounds = array<i64: 1, 896>}, {transform_indices = @transform_7, window_bounds = array<i64: 8, 896>}, {transform_indices = @transform_8, window_bounds = array<i64: 8, 896>}]} {
    %c0 = arith.constant 0 : index
    %c0_0 = arith.constant 0 : index
    %0 = vector.load %arg1[%c0, %c0_0] : memref<8x32xbf16, #tpu.memory_space<vmem>>, vector<8x32xbf16>
    %c0_1 = arith.constant 0 : index
    %c0_2 = arith.constant 0 : index
    %1 = vector.load %arg2[%c0_1, %c0_2] : memref<32x128xbf16, #tpu.memory_space<vmem>>, vector<32x128xbf16>
    %cst = arith.constant dense<0.000000e+00> : vector<8x128xf32>
    %2 = tpu.matmul %0, %1, %cst {dimension_numbers = #tpu.dot_dimension_numbers<[1], [0], [0], [1], [0, 0, 1, 1], [], []>} : vector<8x32xbf16>, vector<32x128xbf16>, vector<8x128xf32> -> vector<8x128xf32>
    %c0_3 = arith.constant 0 : index
    %c0_4 = arith.constant 0 : index
    %3 = vector.load %arg3[%c0_3, %c0_4] : memref<1x128xf32, #tpu.memory_space<vmem>>, vector<1x128xf32>
    %4 = vector.broadcast %3 : vector<1x128xf32> to vector<8x128xf32>
    %5 = arith.addf %2, %4 : vector<8x128xf32>
    %cst_5 = arith.constant 0.000000e+00 : f32
    %6 = vector.broadcast %cst_5 : f32 to vector<8x128xf32>
    %7 = arith.maximumf %5, %6 : vector<8x128xf32>
    %8 = arith.truncf %7 : vector<8x128xf32> to vector<8x128xbf16>
    %c0_6 = arith.constant 0 : index
    %c0_7 = arith.constant 0 : index
    %9 = vector.load %arg4[%c0_6, %c0_7] : memref<128x128xbf16, #tpu.memory_space<vmem>>, vector<128x128xbf16>
    %cst_8 = arith.constant dense<0.000000e+00> : vector<8x128xf32>
    %10 = tpu.matmul %8, %9, %cst_8 {dimension_numbers = #tpu.dot_dimension_numbers<[1], [0], [0], [1], [0, 0, 1, 1], [], []>} : vector<8x128xbf16>, vector<128x128xbf16>, vector<8x128xf32> -> vector<8x128xf32>
    %c0_9 = arith.constant 0 : index
    %c0_10 = arith.constant 0 : index
    %11 = vector.load %arg5[%c0_9, %c0_10] : memref<1x128xf32, #tpu.memory_space<vmem>>, vector<1x128xf32>
    %12 = vector.broadcast %11 : vector<1x128xf32> to vector<8x128xf32>
    %13 = arith.addf %10, %12 : vector<8x128xf32>
    %cst_11 = arith.constant 0.000000e+00 : f32
    %14 = vector.broadcast %cst_11 : f32 to vector<8x128xf32>
    %15 = arith.maximumf %13, %14 : vector<8x128xf32>
    %16 = arith.truncf %15 : vector<8x128xf32> to vector<8x128xbf16>
    %c0_12 = arith.constant 0 : index
    %c0_13 = arith.constant 0 : index
    %17 = vector.load %arg6[%c0_12, %c0_13] : memref<128x896xbf16, #tpu.memory_space<vmem>>, vector<128x896xbf16>
    %cst_14 = arith.constant dense<0.000000e+00> : vector<8x896xf32>
    %18 = tpu.matmul %16, %17, %cst_14 {dimension_numbers = #tpu.dot_dimension_numbers<[1], [0], [0], [1], [0, 0, 1, 1], [], []>} : vector<8x128xbf16>, vector<128x896xbf16>, vector<8x896xf32> -> vector<8x896xf32>
    %c0_15 = arith.constant 0 : index
    %c0_16 = arith.constant 0 : index
    %19 = vector.load %arg7[%c0_15, %c0_16] : memref<1x896xf32, #tpu.memory_space<vmem>>, vector<1x896xf32>
    %20 = vector.broadcast %19 : vector<1x896xf32> to vector<8x896xf32>
    %21 = arith.addf %18, %20 : vector<8x896xf32>
    %c0_17 = arith.constant 0 : index
    %c0_18 = arith.constant 0 : index
    %22 = vector.load %arg8[%c0_17, %c0_18] : memref<8x896xf32, #tpu.memory_space<vmem>>, vector<8x896xf32>
    tpu.vector_store %arg8[%c0_17, %c0_18], %21 {strides = array<i32>} : memref<8x896xf32, #tpu.memory_space<vmem>>, vector<8x896xf32>,
    %23 = arith.negf %21 : vector<8x896xf32>
    %24 = math.exp %23 : vector<8x896xf32>
    %cst_19 = arith.constant 1.000000e+00 : f32
    %25 = vector.broadcast %cst_19 : f32 to vector<8x896xf32>
    %26 = arith.addf %25, %24 : vector<8x896xf32>
    %27 = arith.divf %25, %26 : vector<8x896xf32>
    %c0_20 = arith.constant 0 : index
    %c0_21 = arith.constant 0 : index
    %28 = vector.load %arg9[%c0_20, %c0_21] : memref<8x896xf32, #tpu.memory_space<vmem>>, vector<8x896xf32>
    tpu.vector_store %arg9[%c0_20, %c0_21], %27 {strides = array<i32>} : memref<8x896xf32, #tpu.memory_space<vmem>>, vector<8x896xf32>,
    return
  }
  func.func @transform_0(%arg0: i32) -> (i32, i32) {
    %c0_i32 = arith.constant 0 : i32
    %c0_i32_0 = arith.constant 0 : i32
    return %arg0, %c0_i32 : i32, i32
  }
  func.func @transform_1(%arg0: i32) -> (i32, i32) {
    %c0_i32 = arith.constant 0 : i32
    %c0_i32_0 = arith.constant 0 : i32
    %c0_i32_1 = arith.constant 0 : i32
    return %c0_i32, %c0_i32_0 : i32, i32
  }
  func.func @transform_2(%arg0: i32) -> (i32, i32) {
    %c0_i32 = arith.constant 0 : i32
    %c0_i32_0 = arith.constant 0 : i32
    %c0_i32_1 = arith.constant 0 : i32
    return %c0_i32, %c0_i32_0 : i32, i32
  }
  func.func @transform_3(%arg0: i32) -> (i32, i32) {
    %c0_i32 = arith.constant 0 : i32
    %c0_i32_0 = arith.constant 0 : i32
    %c0_i32_1 = arith.constant 0 : i32
    return %c0_i32, %c0_i32_0 : i32, i32
  }
  func.func @transform_4(%arg0: i32) -> (i32, i32) {
    %c0_i32 = arith.constant 0 : i32
    %c0_i32_0 = arith.constant 0 : i32
    %c0_i32_1 = arith.constant 0 : i32
    return %c0_i32, %c0_i32_0 : i32, i32
  }
  func.func @transform_5(%arg0: i32) -> (i32, i32) {
    %c0_i32 = arith.constant 0 : i32
    %c0_i32_0 = arith.constant 0 : i32
    %c0_i32_1 = arith.constant 0 : i32
    return %c0_i32, %c0_i32_0 : i32, i32
  }
  func.func @transform_6(%arg0: i32) -> (i32, i32) {
    %c0_i32 = arith.constant 0 : i32
    %c0_i32_0 = arith.constant 0 : i32
    %c0_i32_1 = arith.constant 0 : i32
    return %c0_i32, %c0_i32_0 : i32, i32
  }
  func.func @transform_7(%arg0: i32) -> (i32, i32) {
    %c0_i32 = arith.constant 0 : i32
    %c0_i32_0 = arith.constant 0 : i32
    return %arg0, %c0_i32 : i32, i32
  }
  func.func @transform_8(%arg0: i32) -> (i32, i32) {
    %c0_i32 = arith.constant 0 : i32
    %c0_i32_0 = arith.constant 0 : i32
    return %arg0, %c0_i32 : i32, i32
  }
}

</mosaic_0001>

<bundles_post_ra>
// kernel: tpu_custom_call.1
= control target key start
LH: loop header
LB: loop body
LE: loop exit
PB: predicated region body
PF: predicated region fallthrough
CT: control target
= control target key end

     0   :  { %14 = vsyncpa [#allocation3], 0  ;;  %s1623_s0 = inlined_call_operand.hbm [shape: bf16[8,32], index: 0, kind: input, shape index: {}]   ;;  %s1624_s1 = inlined_call_operand.hbm [shape: bf16[32,128], index: 1, kind: input, shape index: {}]   ;;  %s1625_s2 = inlined_call_operand.hbm [shape: f32[1,128], index: 2, kind: input, shape index: {}]   ;;  %s1626_s3 = inlined_call_operand.hbm [shape: bf16[128,128], index: 3, kind: input, shape index: {}]   ;;  %s1627_s4 = inlined_call_operand.hbm [shape: f32[1,128], index: 4, kind: input, shape index: {}]   ;;  %s1628_s5 = inlined_call_operand.hbm [shape: bf16[128,896], index: 5, kind: input, shape index: {}]   ;;  %s1629_s6 = inlined_call_operand.hbm [shape: f32[1,896], index: 6, kind: input, shape index: {}]   ;;  %s1630_s7 = inlined_call_operand.hbm [shape: f32[8,896], index: 7, kind: output, shape index: {0}]   ;;  %s1631_s8 = inlined_call_operand.hbm [shape: f32[8,896], index: 8, kind: output, shape index: {1}]  }
   0x1   :  { %15 = vsyncpa [#allocation6], 0 }
   0x2   :  { %16 = vsyncpa [#allocation9], 0 }
   0x3   :  { %17 = vsyncpa [#allocation12], 0 }
   0x4   :  { %18 = vsyncpa [#allocation4], 0 }
   0x5   :  { %19 = vsyncpa [#allocation16], 0  ;;  %s1430_s27 = smov [#allocation5]   ;;  %s1220_s9 = scalar_lea.hbm %s1624_s1, 256 }
   0x6   :  { %s35_s28 = sshll.u32 %s1430_s27, 4  ;;  %p1221_p0 = scmp.ne.s32.totalorder %s1624_s1, %s1220_s9  ;;  %s36_s28 = int_to_ptr.vmem [resolvable:$true] %s35_s28 }
   0x7   :  { %p1224_p1 = scmp.lt.u32.totalorder %s1220_s9, %s1624_s1 }
   0x9   :  { %p1226_p2 = pnand %p1224_p1, %p1221_p0 }
   0xb   :  { %1229 = shalt.err (!%p1226_p2)
}
   0xc   :  { %s1230_s14 = scalar_lea.vmem %s36_s28, 256  ;;  %p1235_p4 = scmp.lt.s32.totalorder %s36_s28, %s36_s28 }
   0xd   :  { %p1231_p3 = scmp.ne.s32.totalorder %s36_s28, %s1230_s14  ;;  %p1236_p5 = scmp.lt.s32.totalorder %s1230_s14, %s1230_s14 }
   0xf   :  { %p1237_p6 = por %p1236_p5, %p1235_p4 }
  0x11   :  { %p1238_p7 = pnand %p1237_p6, %p1231_p3 }
  0x13   :  { %1241 = shalt.err (!%p1238_p7)
}
  0x14   :  { %s1431_s15 = smov 64   ;;  %s1432_s16 = smov 4  }
  0x15   :  { %41 = dma.hbm_to_vmem [thread:$0]  %s1624_s1, 256, %s36_s28, [#allocation6], %s1431_s15, %s1431_s15, %s1432_s16  }
  0x16   :  { %s1433_s19 = smov [#allocation8]   ;;  %s1434_s21 = smov [#allocation11]  }
  0x17   :  { %s57_s20 = sshll.u32 %s1433_s19, 4  ;;  %s79_s22 = sshll.u32 %s1434_s21, 4  ;;  %s58_s20 = int_to_ptr.vmem [resolvable:$true] %s57_s20  ;;  %s80_s22 = int_to_ptr.vmem [resolvable:$true] %s79_s22 }
  0x18   :  { %s1242_s25 = scalar_lea.hbm %s1626_s3, 1024 }
  0x19   :  { %p1243_p8 = scmp.ne.s32.totalorder %s1626_s3, %s1242_s25  ;;  %p1246_p9 = scmp.lt.u32.totalorder %s1242_s25, %s1626_s3 }
  0x1b   :  { %p1248_p10 = pnand %p1246_p9, %p1243_p8 }
  0x1d   :  { %1251 = shalt.err (!%p1248_p10)
}
  0x1e   :  { %s1252_s1 = scalar_lea.vmem %s58_s20, 1024  ;;  %p1257_p12 = scmp.lt.s32.totalorder %s58_s20, %s58_s20 }
  0x1f   :  { %p1253_p11 = scmp.ne.s32.totalorder %s58_s20, %s1252_s1  ;;  %p1258_p13 = scmp.lt.s32.totalorder %s1252_s1, %s1252_s1 }
  0x21   :  { %p1259_p0 = por %p1258_p13, %p1257_p12 }
  0x23   :  { %p1260_p1 = pnand %p1259_p0, %p1253_p11 }
  0x25   :  { %1263 = shalt.err (!%p1260_p1)
}
  0x26   :  { %63 = dma.hbm_to_vmem [thread:$0]  %s1626_s3, 1024, %s58_s20, [#allocation9], %s1431_s15, %s1431_s15, %s1432_s16  }
  0x27   :  { %s1264_s12 = scalar_lea.hbm %s1628_s5, 7168 }
  0x28   :  { %p1265_p2 = scmp.ne.s32.totalorder %s1628_s5, %s1264_s12  ;;  %p1268_p3 = scmp.lt.u32.totalorder %s1264_s12, %s1628_s5 }
  0x2a   :  { %p1270_p4 = pnand %p1268_p3, %p1265_p2 }
  0x2c   :  { %1273 = shalt.err (!%p1270_p4)
}
  0x2d   :  { %s1274_s19 = scalar_lea.vmem %s80_s22, 7168  ;;  %p1279_p6 = scmp.lt.s32.totalorder %s80_s22, %s80_s22 }
  0x2e   :  { %p1275_p5 = scmp.ne.s32.totalorder %s80_s22, %s1274_s19  ;;  %p1280_p7 = scmp.lt.s32.totalorder %s1274_s19, %s1274_s19 }
  0x30   :  { %p1281_p8 = por %p1280_p7, %p1279_p6 }
  0x32   :  { %p1282_p9 = pnand %p1281_p8, %p1275_p5 }
  0x34   :  { %1285 = shalt.err (!%p1282_p9)
}
  0x35   :  { %s1435_s3 = smov 448   ;;  %s1436_s15 = smov 28  }
  0x36   :  { %85 = dma.hbm_to_vmem [thread:$0]  %s1628_s5, 7168, %s80_s22, [#allocation12], %s1435_s3, %s1435_s3, %s1436_s15  }
  0x37   :  { %s1437_s21 = smov [#allocation2]   ;;  %s1438_s24 = smov [#allocation7]  }
  0x38   :  { %s26_s23 = sshll.u32 %s1437_s21, 4  ;;  %s48_s25 = sshll.u32 %s1438_s24, 4  ;;  %s27_s23 = int_to_ptr.vmem [resolvable:$true] %s26_s23  ;;  %s49_s25 = int_to_ptr.vmem [resolvable:$true] %s48_s25 }
  0x39   :  { %s1286_s29 = scalar_lea.hbm %s1623_s0, 64 }
  0x3a   :  { %p1287_p10 = scmp.ne.s32.totalorder %s1623_s0, %s1286_s29  ;;  %p1290_p11 = scmp.lt.u32.totalorder %s1286_s29, %s1623_s0 }
  0x3c   :  { %p1292_p12 = pnand %p1290_p11, %p1287_p10 }
  0x3e   :  { %1295 = shalt.err (!%p1292_p12)
}
  0x3f   :  { %s1296_s5 = scalar_lea.vmem %s27_s23, 64  ;;  %p1301_p0 = scmp.lt.s32.totalorder %s27_s23, %s27_s23 }
  0x40   :  { %p1297_p13 = scmp.ne.s32.totalorder %s27_s23, %s1296_s5  ;;  %p1302_p1 = scmp.lt.s32.totalorder %s1296_s5, %s1296_s5 }
  0x42   :  { %p1303_p2 = por %p1302_p1, %p1301_p0 }
  0x44   :  { %p1304_p3 = pnand %p1303_p2, %p1297_p13 }
  0x46   :  { %1307 = shalt.err (!%p1304_p3)
}
  0x47   :  { %29 = dma.hbm_to_vmem [thread:$0]  %s1623_s0, 64, %s27_s23, [#allocation3]  }
  0x48   :  { %s1308_s13 = scalar_lea.hbm %s1625_s2, 16 }
  0x49   :  { %p1309_p4 = scmp.ne.s32.totalorder %s1625_s2, %s1308_s13  ;;  %p1312_p5 = scmp.lt.u32.totalorder %s1308_s13, %s1625_s2 }
  0x4b   :  { %p1314_p6 = pnand %p1312_p5, %p1309_p4 }
  0x4d   :  { %1317 = shalt.err (!%p1314_p6)
}
  0x4e   :  { %s1318_s3 = scalar_lea.vmem %s49_s25, 16  ;;  %s1322_s15 = scalar_lea.vmem %s49_s25, 32 }
  0x4f   :  { %p1319_p7 = scmp.ne.s32.totalorder %s49_s25, %s1318_s3  ;;  %p1323_p8 = scmp.lt.s32.totalorder %s49_s25, %s49_s25 }
  0x50   :  { %p1324_p9 = scmp.lt.s32.totalorder %s1322_s15, %s1318_s3 }
  0x52   :  { %p1325_p10 = por %p1324_p9, %p1323_p8 }
  0x54   :  { %p1326_p11 = pnand %p1325_p10, %p1319_p7 }
  0x56   :  { %1329 = shalt.err (!%p1326_p11)
}
  0x57   :  { %51 = dma.hbm_to_vmem [thread:$0]  %s1625_s2, 16, %s49_s25, [#allocation6]  }
  0x58   :  { %s1439_s20 = smov [#allocation10]   ;;  %s1440_s23 = smov [#allocation13]  }
  0x59   :  { %s70_s21 = sshll.u32 %s1439_s20, 4  ;;  %s92_s24 = sshll.u32 %s1440_s23, 4  ;;  %s71_s21 = int_to_ptr.vmem [resolvable:$true] %s70_s21  ;;  %s93_s24 = int_to_ptr.vmem [resolvable:$true] %s92_s24 }
  0x5a   :  { %s1330_s29 = scalar_lea.hbm %s1627_s4, 16 }
  0x5b   :  { %p1331_p12 = scmp.ne.s32.totalorder %s1627_s4, %s1330_s29  ;;  %p1334_p13 = scmp.lt.u32.totalorder %s1330_s29, %s1627_s4 }
  0x5d   :  { %p1336_p0 = pnand %p1334_p13, %p1331_p12 }
  0x5f   :  { %1339 = shalt.err (!%p1336_p0)
}
  0x60   :  { %s1340_s2 = scalar_lea.vmem %s71_s21, 16  ;;  %s1344_s25 = scalar_lea.vmem %s71_s21, 32 }
  0x61   :  { %p1341_p1 = scmp.ne.s32.totalorder %s71_s21, %s1340_s2  ;;  %p1345_p2 = scmp.lt.s32.totalorder %s71_s21, %s71_s21 }
  0x62   :  { %p1346_p3 = scmp.lt.s32.totalorder %s1344_s25, %s1340_s2 }
  0x64   :  { %p1347_p4 = por %p1346_p3, %p1345_p2 }
  0x66   :  { %p1348_p5 = pnand %p1347_p4, %p1341_p1 }
  0x68   :  { %1351 = shalt.err (!%p1348_p5)
}
  0x69   :  { %73 = dma.hbm_to_vmem [thread:$0]  %s1627_s4, 16, %s71_s21, [#allocation9]  }
  0x6a   :  { %s1352_s12 = scalar_lea.hbm %s1629_s6, 112 }
  0x6b   :  { %p1353_p6 = scmp.ne.s32.totalorder %s1629_s6, %s1352_s12  ;;  %p1356_p7 = scmp.lt.u32.totalorder %s1352_s12, %s1629_s6 }
  0x6d   :  { %p1358_p8 = pnand %p1356_p7, %p1353_p6 }
  0x6f   :  { %1361 = shalt.err (!%p1358_p8)
}
  0x70   :  { %s1362_s19 = scalar_lea.vmem %s93_s24, 112  ;;  %s1366_s3 = scalar_lea.vmem %s93_s24, 128 }
  0x71   :  { %p1363_p9 = scmp.ne.s32.totalorder %s93_s24, %s1362_s19  ;;  %p1367_p10 = scmp.lt.s32.totalorder %s93_s24, %s93_s24 }
  0x72   :  { %p1368_p11 = scmp.lt.s32.totalorder %s1366_s3, %s1362_s19 }
  0x74   :  { %p1369_p12 = por %p1368_p11, %p1367_p10 }
  0x76   :  { %p1370_p13 = pnand %p1369_p12, %p1363_p9 }
  0x78   :  { %1373 = shalt.err (!%p1370_p13)
}
  0x79   :  { %95 = dma.hbm_to_vmem [thread:$0]  %s1629_s6, 112, %s93_s24, [#allocation12]  }
  0x7a   :  { %1418 = dma.done.wait [#allocation3], 64  }
  0x7b   :  { %1419 = vsyncadd [#allocation3], 4294967232 }
  0x7c   :  { %1420 = dma.done.wait [#allocation6], 272  }
  0x7d   :  { %1421 = vsyncadd [#allocation6], 4294967024 }
  0x7e   :  { %1422 = dma.done.wait [#allocation9], 1040  }
  0x7f   :  { %1423 = vsyncadd [#allocation9], 4294966256 }
  0x80   :  { %1424 = dma.done.wait [#allocation12], 7280  }
  0x81   :  { %1425 = vsyncadd [#allocation12], 4294960016  ;;  %v1441_v0 = vmov 0.0   ;;  %vm1442_vm0 = vmmov 0   ;;  %v1102_v1 = vld [vmem:[#allocation5] sm:$0xff]   ;;  %v1103_v2 = vld [vmem:[#allocation5 + $0x8] sm:$0xff]  }
  0x82   :  { %1038 = vmatprep.subr.bf16.mxu0 %v1441_v0  ;;  %1042 = vmatprep.mubr.msk.bf16.mxu0 %vm1442_vm0, %v1441_v0  ;;  %v1104_v3 = vld [vmem:[#allocation8] sm:$0xff]   ;;  %vm142_vm1 = vcmask 261120   ;;  %v1105_v4 = vld [vmem:[#allocation8 + $0x8] sm:$0xff]   ;;  %v1106_v6 = vld [vmem:[#allocation8 + $0x10] sm:$0xff]   ;;  %v1443_v53 = vmov 0   ;;  %s1444_s6 = smov [#allocation14]  }
  0x83   :  { %1046 = vmatprep.subr.bf16.mxu1 %v1441_v0  ;;  %1062 = vmatprep.mubr.msk.bf16.mxu1 %vm1442_vm0, %v1441_v0  ;;  %v118_v5 = vld [vmem:[#allocation2] sm:$0xf]  ;;  %v1107_v7 = vld [vmem:[#allocation8 + $0x18] sm:$0xff]   ;;  %v1108_v8 = vld [vmem:[#allocation8 + $0x20] sm:$0xff]   ;;  %s915_s0 = sshll.u32 %s1444_s6, 4  ;;  %s916_s0 = int_to_ptr.vmem [resolvable:$true] %s915_s0 }
  0x84   :  { %1039 = vmatpush3.bf16.msra.mxu0 %v1102_v1  ;;  %1047 = vmatpush3.bf16.msra.mxu1 %v1104_v3  ;;  %v1109_v9 = vld [vmem:[#allocation8 + $0x28] sm:$0xff]   ;;  %v1110_v10 = vld [vmem:[#allocation8 + $0x30] sm:$0xff]   ;;  %v1111_v11 = vld [vmem:[#allocation8 + $0x38] sm:$0xff]   ;;  %s1374_s16 = scalar_lea.vmem %s916_s0, 896  ;;  %p1379_p1 = scmp.lt.s32.totalorder %s916_s0, %s916_s0 }
  0x85   :  { %1040 = vmatprep.subr.bf16.mxu0 %v1441_v0  ;;  %1048 = vmatprep.subr.bf16.mxu1 %v1441_v0  ;;  %v1112_v12 = vld [vmem:[#allocation11] ss:$28 sps:$4 sm:$0xff]   ;;  %v1117_v14 = vld [vmem:[#allocation11 + $0xc] ss:$28 sps:$4 sm:$0xff]   ;;  %v1118_v16 = vld [vmem:[#allocation11 + $0x38] ss:$28 sps:$4 sm:$0xff]   ;;  %p1375_p0 = scmp.ne.s32.totalorder %s916_s0, %s1374_s16  ;;  %p1380_p2 = scmp.lt.s32.totalorder %s1374_s16, %s1374_s16 }
  0x86   :  { %v1114_v13 = vld [vmem:[#allocation11 + $0x4] ss:$28 sps:$4 sm:$0xff]   ;;  %v1120_v15 = vld [vmem:[#allocation11 + $0x3c] ss:$28 sps:$4 sm:$0xff]   ;;  %v1126_v17 = vld [vmem:[#allocation11 + $0x74] ss:$28 sps:$4 sm:$0xff]  }
  0x87   :  { %v1124_v18 = vld [vmem:[#allocation11 + $0x70] ss:$28 sps:$4 sm:$0xff]   ;;  %v1130_v20 = vld [vmem:[#allocation11 + $0xa8] ss:$28 sps:$4 sm:$0xff]   ;;  %v1136_v22 = vld [vmem:[#allocation11 + $0xe0] ss:$28 sps:$4 sm:$0xff]   ;;  %p1381_p3 = por %p1380_p2, %p1379_p1 }
  0x88   :  { %1041 = vmatpush3.bf16.msra.mxu0 %v1103_v2  ;;  %1049 = vmatpush3.bf16.msra.mxu1 %v1105_v4  ;;  %v1132_v19 = vld [vmem:[#allocation11 + $0xac] ss:$28 sps:$4 sm:$0xff]   ;;  %v1138_v21 = vld [vmem:[#allocation11 + $0xe4] ss:$28 sps:$4 sm:$0xff]   ;;  %v1144_v23 = vld [vmem:[#allocation11 + $0x11c] ss:$28 sps:$4 sm:$0xff]  }
  0x89   :  { %1050 = vmatprep.subr.bf16.mxu1 %v1441_v0  ;;  %690 = vmatprep.subr.bf16.mxu0 %v1114_v13  ;;  %v1142_v24 = vld [vmem:[#allocation11 + $0x118] ss:$28 sps:$4 sm:$0xff]   ;;  %v1148_v26 = vld [vmem:[#allocation11 + $0x150] ss:$28 sps:$4 sm:$0xff]   ;;  %v941_v27 = vld [vmem:[#allocation7] ss:$0 sm:$0xff]  ;;  %p1382_p4 = pnand %p1381_p3, %p1375_p0 }
  0x8a   :  { %v1150_v25 = vld [vmem:[#allocation11 + $0x154] ss:$28 sps:$4 sm:$0xff]   ;;  %v1115_v34 = vld [vmem:[#allocation11 + $0x8] ss:$28 sps:$4 sm:$0xff]   ;;  %v1121_v37 = vld [vmem:[#allocation11 + $0x40] ss:$28 sps:$4 sm:$0xff]  }
  0x8b   :  { %1043 = vmatmul.mubr.msk.bf16.vlgmr.msra.gmra.mrb[0].mxu0 %vm142_vm1, %v118_v5  ;;  %v1123_v36 = vld [vmem:[#allocation11 + $0x44] ss:$28 sps:$4 sm:$0xff]   ;;  %v1129_v38 = vld [vmem:[#allocation11 + $0x7c] ss:$28 sps:$4 sm:$0xff]   ;;  %v1135_v40 = vld [vmem:[#allocation11 + $0xb4] ss:$28 sps:$4 sm:$0xff]  }
  0x8c   :  { %1051 = vmatpush3.bf16.msra.mxu1 %v1106_v6  ;;  %691 = vmatpush1.bf16.msra.mxu0 %v1112_v12  ;;  %v1127_v39 = vld [vmem:[#allocation11 + $0x78] ss:$28 sps:$4 sm:$0xff]   ;;  %v1133_v41 = vld [vmem:[#allocation11 + $0xb0] ss:$28 sps:$4 sm:$0xff]   ;;  %v1139_v43 = vld [vmem:[#allocation11 + $0xe8] ss:$28 sps:$4 sm:$0xff]  }
  0x8d   :  { %1052 = vmatprep.subr.bf16.mxu1 %v1441_v0  ;;  %692 = vmatprep.subr.bf16.mxu0 %v1120_v15  ;;  %v1141_v42 = vld [vmem:[#allocation11 + $0xec] ss:$28 sps:$4 sm:$0xff]   ;;  %v1147_v44 = vld [vmem:[#allocation11 + $0x124] ss:$28 sps:$4 sm:$0xff]   ;;  %v1153_v46 = vld [vmem:[#allocation11 + $0x15c] ss:$28 sps:$4 sm:$0xff]  }
  0x8e   :  { %v1145_v45 = vld [vmem:[#allocation11 + $0x120] ss:$28 sps:$4 sm:$0xff]   ;;  %v1151_v47 = vld [vmem:[#allocation11 + $0x158] ss:$28 sps:$4 sm:$0xff]   ;;  %v1156_v48 = vld [vmem:[#allocation11 + $0x18c] ss:$28 sps:$4 sm:$0xff]   ;;  %722 = vmatprep.mubr.bf16.mxu0 %v1443_v53 }
  0x8f   :  { %v1159_v49 = vld [vmem:[#allocation11 + $0x194] ss:$28 sps:$4 sm:$0xff]   ;;  %v1154_v50 = vld [vmem:[#allocation11 + $0x188] ss:$28 sps:$4 sm:$0xff]   ;;  %v945_v54 = vld [vmem:[#allocation10] ss:$0 sm:$0xff] }
  0x90   :  { %1053 = vmatpush3.bf16.msra.mxu1 %v1107_v7  ;;  %693 = vmatpush1.bf16.msra.mxu0 %v1118_v16  ;;  %v1157_v51 = vld [vmem:[#allocation11 + $0x190] ss:$28 sps:$4 sm:$0xff]   ;;  %v1163_v62 = vld [vmem:[#allocation11 + $0x18] ss:$28 sps:$4 sm:$0xff]   ;;  %v1164_v2 = vld [vmem:[#allocation11 + $0x48] ss:$28 sps:$4 sm:$0xff]  }
  0x91   :  { %1054 = vmatprep.subr.bf16.mxu1 %v1441_v0  ;;  %694 = vmatprep.subr.bf16.mxu0 %v1126_v17  ;;  %v1162_v52 = vld [vmem:[#allocation11 + $0x14] ss:$28 sps:$4 sm:$0xff]   ;;  %v1166_v1 = vld [vmem:[#allocation11 + $0x4c] ss:$28 sps:$4 sm:$0xff]   ;;  %v1170_v4 = vld [vmem:[#allocation11 + $0x84] ss:$28 sps:$4 sm:$0xff]  }
  0x92   :  { %v1160_v61 = vld [vmem:[#allocation11 + $0x10] ss:$28 sps:$4 sm:$0xff]   ;;  %v1168_v5 = vld [vmem:[#allocation11 + $0x80] ss:$28 sps:$4 sm:$0xff]   ;;  %v1171_v6 = vld [vmem:[#allocation11 + $0x88] ss:$28 sps:$4 sm:$0xff]  }
  0x93   :  { %v1167_v3 = vld [vmem:[#allocation11 + $0x50] ss:$28 sps:$4 sm:$0xff]   ;;  %v1174_v7 = vld [vmem:[#allocation11 + $0xbc] ss:$28 sps:$4 sm:$0xff]   ;;  %v1186_v16 = vld [vmem:[#allocation11 + $0x164] ss:$28 sps:$4 sm:$0xff]  }
  0x94   :  { %1055 = vmatpush3.bf16.msra.mxu1 %v1108_v8  ;;  %695 = vmatpush1.bf16.msra.mxu0 %v1124_v18  ;;  %v1172_v8 = vld [vmem:[#allocation11 + $0xb8] ss:$28 sps:$4 sm:$0xff]   ;;  %v1182_v13 = vld [vmem:[#allocation11 + $0x12c] ss:$28 sps:$4 sm:$0xff]   ;;  %v1184_v17 = vld [vmem:[#allocation11 + $0x160] ss:$28 sps:$4 sm:$0xff]  }
  0x95   :  { %1056 = vmatprep.subr.bf16.mxu1 %v1441_v0  ;;  %696 = vmatprep.subr.bf16.mxu0 %v1132_v19  ;;  %v1179_v12 = vld [vmem:[#allocation11 + $0xf8] ss:$28 sps:$4 sm:$0xff]   ;;  %v1183_v15 = vld [vmem:[#allocation11 + $0x130] ss:$28 sps:$4 sm:$0xff]   ;;  %v1187_v18 = vld [vmem:[#allocation11 + $0x168] ss:$28 sps:$4 sm:$0xff]  }
  0x96   :  { %v1190_v19 = vld [vmem:[#allocation11 + $0x19c] ss:$28 sps:$4 sm:$0xff]  }
  0x98   :  { %1057 = vmatpush3.bf16.msra.mxu1 %v1109_v9  ;;  %697 = vmatpush1.bf16.msra.mxu0 %v1130_v20  ;;  %v1175_v9 = vld [vmem:[#allocation11 + $0xc0] ss:$28 sps:$4 sm:$0xff]   ;;  %v1188_v20 = vld [vmem:[#allocation11 + $0x198] ss:$28 sps:$4 sm:$0xff]  }
  0x99   :  { %1058 = vmatprep.subr.bf16.mxu1 %v1441_v0  ;;  %698 = vmatprep.subr.bf16.mxu0 %v1138_v21  ;;  %v1191_v21 = vld [vmem:[#allocation11 + $0x1a0] ss:$28 sps:$4 sm:$0xff]  }
  0x9c   :  { %1059 = vmatpush3.bf16.msra.mxu1 %v1110_v10  ;;  %699 = vmatpush1.bf16.msra.mxu0 %v1136_v22  ;;  %v1178_v10 = vld [vmem:[#allocation11 + $0xf4] ss:$28 sps:$4 sm:$0xff]   ;;  %v367_v22 = vlaneseq }
  0x9d   :  { %1060 = vmatprep.subr.bf16.mxu1 %v1441_v0  ;;  %700 = vmatprep.subr.bf16.mxu0 %v1144_v23 }
  0x9e   :  { %v368_v23 = vshrl.u32 %v367_v22, 7 }
  0xa0   :  { %1061 = vmatpush3.bf16.msra.mxu1 %v1111_v11  ;;  %701 = vmatpush1.bf16.msra.mxu0 %v1142_v24  ;;  %v1176_v11 = vld [vmem:[#allocation11 + $0xf0] ss:$28 sps:$4 sm:$0xff]   ;;  %v369_v24 = vsub.s32 0, %v368_v23 }
  0xa1   :  { %731 = vmatprep.subr.bf16.mxu1 %v1117_v14  ;;  %702 = vmatprep.subr.bf16.mxu0 %v1150_v25  ;;  %v1180_v14 = vld [vmem:[#allocation11 + $0x128] ss:$28 sps:$4 sm:$0xff]   ;;  %v377_v25 = vsub.s32 2, %v368_v23 }
  0xa4   :  { %703 = vmatpush1.bf16.msra.mxu0 %v1148_v26  ;;  %v365_v26 = vld [vmem:[#allocation13] sm:$0xff] }
  0xa5   :  { %704 = vmatprep.subr.bf16.mxu0 %v1156_v48 }
  0xa8   :  { %705 = vmatpush1.bf16.msra.mxu0 %v1154_v50 }
  0xa9   :  { %772 = vmatprep.subr.bf16.mxu0 %v1162_v52 }
 0x15e   :  { %v180_v28 = vpop.f32.mrb[0].mxu0 }
 0x15f   :  { %v181_v29 = vadd.f32 %v941_v27, %v180_v28  ;;  %v1044_v30 = vpop.f32.mrb[1].mxu0  ;;  %v373_v27 = vsub.s32 1, %v368_v23  ;;  %v381_v28 = vsub.s32 3, %v368_v23 }
 0x160   :  { %v183_v31 = vpop.f32.mrb[2].mxu0  ;;  %v378_v30 = vrot.slane %v365_v26, %v377_v25 }
 0x161   :  { %v186_v32 = vmax.f32 %v181_v29, 0.0  ;;  %v1045_v33 = vpop.f32.mrb[3].mxu0  ;;  %v370_v29 = vrot.slane %v365_v26, %v369_v24  ;;  %v374_v31 = vrot.slane %v365_v26, %v373_v27 }
 0x163   :  { %v187_v35 = vpack.c.bf16 %v186_v32, %v186_v32  ;;  %v382_v32 = vrot.slane %v365_v26, %v381_v28 }
 0x165   :  { %1063 = vmatmul.mubr.bf16.vlgmr.msra.gmra.mrb[0].mxu1 %v187_v35 }
 0x166   :  { %732 = vmatpush1.bf16.msra.mxu1 %v1115_v34  ;;  %763 = vmatprep.mubr.bf16.mxu1 %v1443_v53 }
 0x167   :  { %733 = vmatprep.subr.bf16.mxu1 %v1123_v36 }
 0x16a   :  { %734 = vmatpush1.bf16.msra.mxu1 %v1121_v37 }
 0x16b   :  { %735 = vmatprep.subr.bf16.mxu1 %v1129_v38 }
 0x16e   :  { %736 = vmatpush1.bf16.msra.mxu1 %v1127_v39 }
 0x16f   :  { %737 = vmatprep.subr.bf16.mxu1 %v1135_v40 }
 0x172   :  { %738 = vmatpush1.bf16.msra.mxu1 %v1133_v41 }
 0x173   :  { %739 = vmatprep.subr.bf16.mxu1 %v1141_v42 }
 0x176   :  { %740 = vmatpush1.bf16.msra.mxu1 %v1139_v43 }
 0x177   :  { %741 = vmatprep.subr.bf16.mxu1 %v1147_v44 }
 0x17a   :  { %742 = vmatpush1.bf16.msra.mxu1 %v1145_v45 }
 0x17b   :  { %743 = vmatprep.subr.bf16.mxu1 %v1153_v46 }
 0x17e   :  { %744 = vmatpush1.bf16.msra.mxu1 %v1151_v47 }
 0x17f   :  { %745 = vmatprep.subr.bf16.mxu1 %v1159_v49 }
 0x182   :  { %746 = vmatpush1.bf16.msra.mxu1 %v1157_v51 }
 0x183   :  { %1066 = vmatprep.subr.bf16.mxu1 %v1441_v0 }
 0x238   :  { %v293_v55 = vpop.f32.mrb[0].mxu1 }
 0x239   :  { %v294_v56 = vadd.f32 %v945_v54, %v293_v55  ;;  %v1064_v57 = vpop.f32.mrb[1].mxu1 }
 0x23a   :  { %v296_v58 = vpop.f32.mrb[2].mxu1  ;;  %v393_v57 = vsub.s32 6, %v368_v23 }
 0x23b   :  { %v299_v59 = vmax.f32 %v294_v56, 0.0  ;;  %v1065_v60 = vpop.f32.mrb[3].mxu1  ;;  %v385_v56 = vsub.s32 4, %v368_v23  ;;  %v389_v58 = vsub.s32 5, %v368_v23 }
 0x23d   :  { %v300_v63 = vpack.c.bf16 %v299_v59, %v299_v59 }
 0x23f   :  { %723 = vmatmul.mubr.bf16.vlgmr.msra.gmra.mrb[4].mxu0 %v300_v63  ;;  %764 = vmatmul.mubr.bf16.vlgmr.msra.gmra.mrb[4].mxu1 %v300_v63 }
 0x240   :  { %773 = vmatpush1.bf16.msra.mxu0 %v1160_v61  ;;  %1067 = vmatpush3.bf16.msra.mxu1 %v1163_v62  ;;  %v386_v61 = vrot.slane %v365_v26, %v385_v56  ;;  %v394_v62 = vrot.slane %v365_v26, %v393_v57 }
 0x241   :  { %774 = vmatprep.subr.bf16.mxu0 %v1166_v1  ;;  %1068 = vmatprep.subr.bf16.mxu1 %v1441_v0  ;;  %v390_v1 = vrot.slane %v365_v26, %v389_v58 }
 0x242   :  { %804 = vmatprep.mubr.bf16.mxu0 %v1443_v53  ;;  %1082 = vmatprep.mubr.msk.bf16.mxu1 %vm1442_vm0, %v1441_v0 }
 0x244   :  { %775 = vmatpush1.bf16.msra.mxu0 %v1164_v2  ;;  %1069 = vmatpush3.bf16.msra.mxu1 %v1167_v3 }
 0x245   :  { %776 = vmatprep.subr.bf16.mxu0 %v1170_v4  ;;  %1070 = vmatprep.subr.bf16.mxu1 %v1441_v0 }
 0x248   :  { %777 = vmatpush1.bf16.msra.mxu0 %v1168_v5  ;;  %1071 = vmatpush3.bf16.msra.mxu1 %v1171_v6 }
 0x249   :  { %778 = vmatprep.subr.bf16.mxu0 %v1174_v7  ;;  %1072 = vmatprep.subr.bf16.mxu1 %v1441_v0 }
 0x24c   :  { %779 = vmatpush1.bf16.msra.mxu0 %v1172_v8  ;;  %1073 = vmatpush3.bf16.msra.mxu1 %v1175_v9 }
 0x24d   :  { %780 = vmatprep.subr.bf16.mxu0 %v1178_v10  ;;  %1074 = vmatprep.subr.bf16.mxu1 %v1441_v0 }
 0x250   :  { %781 = vmatpush1.bf16.msra.mxu0 %v1176_v11  ;;  %1075 = vmatpush3.bf16.msra.mxu1 %v1179_v12 }
 0x251   :  { %782 = vmatprep.subr.bf16.mxu0 %v1182_v13  ;;  %1076 = vmatprep.subr.bf16.mxu1 %v1441_v0 }
 0x254   :  { %783 = vmatpush1.bf16.msra.mxu0 %v1180_v14  ;;  %1077 = vmatpush3.bf16.msra.mxu1 %v1183_v15 }
 0x255   :  { %784 = vmatprep.subr.bf16.mxu0 %v1186_v16  ;;  %1078 = vmatprep.subr.bf16.mxu1 %v1441_v0 }
 0x258   :  { %785 = vmatpush1.bf16.msra.mxu0 %v1184_v17  ;;  %1079 = vmatpush3.bf16.msra.mxu1 %v1187_v18 }
 0x259   :  { %786 = vmatprep.subr.bf16.mxu0 %v1190_v19  ;;  %1080 = vmatprep.subr.bf16.mxu1 %v1441_v0 }
 0x25c   :  { %787 = vmatpush1.bf16.msra.mxu0 %v1188_v20  ;;  %1081 = vmatpush3.bf16.msra.mxu1 %v1191_v21 }
 0x25f   :  { %805 = vmatmul.mubr.bf16.vlgmr.msra.gmra.mrb[8].mxu0 %v300_v63  ;;  %1083 = vmatmul.mubr.bf16.vlgmr.msra.gmra.mrb[8].mxu1 %v300_v63 }
 0x312   :  { %v724_v33 = vpop.f32.mrb[4].mxu0  ;;  %v765_v34 = vpop.f32.mrb[4].mxu1 }
 0x313   :  { %v725_v35 = vadd.f32 %v724_v33, %v370_v29  ;;  %v766_v36 = vadd.f32 %v765_v34, %v378_v30  ;;  %v726_v0 = vpop.f32.mrb[5].mxu0  ;;  %v767_v37 = vpop.f32.mrb[5].mxu1 }
 0x314   :  { %v727_v38 = vadd.f32 %v726_v0, %v374_v31  ;;  %v768_v39 = vadd.f32 %v767_v37, %v382_v32  ;;  %v728_v40 = vpop.f32.mrb[6].mxu0  ;;  %v769_v41 = vpop.f32.mrb[6].mxu1 }
 0x315   :  { %853 = vst [vmem:[#allocation14] sm:$0xff] %v725_v35  ;;  %v1010_v42 = vmul.f32 -1.442695, %v725_v35  ;;  %855 = vst [vmem:[#allocation14 + $0x10] sm:$0xff] %v766_v36  ;;  %v1012_v43 = vmul.f32 -1.442695, %v766_v36 }
 0x316   :  { %v729_v44 = vpop.f32.mrb[7].mxu0  ;;  %v770_v45 = vpop.f32.mrb[7].mxu1  ;;  %854 = vst [vmem:[#allocation14 + $0x8] sm:$0xff] %v727_v38  ;;  %v1011_v46 = vmul.f32 -1.442695, %v727_v38  ;;  %856 = vst [vmem:[#allocation14 + $0x18] sm:$0xff] %v768_v39 }
 0x317   :  { %v1013_v47 = vmul.f32 -1.442695, %v768_v39  ;;  %1192 = vpow2.f32 %v1010_v42 }
 0x318   :  { %1194 = vpow2.f32 %v1012_v43 }
 0x319   :  { %1196 = vpow2.f32 %v1011_v46 }
 0x31a   :  { %1198 = vpow2.f32 %v1013_v47 }
 0x321   :  { %v1193_v48 = vpop.eup %1192 }
 0x322   :  { %v1195_v49 = vpop.eup %1194  ;;  %v881_v50 = vadd.f32 1.0, %v1193_v48 }
 0x323   :  { %v1197_v51 = vpop.eup %1196  ;;  %v883_v52 = vadd.f32 1.0, %v1195_v49 }
 0x324   :  { %v1199_v53 = vpop.eup %1198  ;;  %1200 = vrcp.f32 %v881_v50  ;;  %v882_v54 = vadd.f32 1.0, %v1197_v51 }
 0x325   :  { %1202 = vrcp.f32 %v883_v52  ;;  %v884_v55 = vadd.f32 1.0, %v1199_v53 }
 0x326   :  { %1204 = vrcp.f32 %v882_v54 }
 0x327   :  { %1206 = vrcp.f32 %v884_v55 }
 0x32e   :  { %v1201_v59 = vpop.eup %1200 }
 0x32f   :  { %v1203_v60 = vpop.eup %1202  ;;  %902 = vst [vmem:[#allocation15] sm:$0xff] %v1201_v59 }
 0x330   :  { %v1205_v63 = vpop.eup %1204  ;;  %904 = vst [vmem:[#allocation15 + $0x10] sm:$0xff] %v1203_v60 }
 0x331   :  { %v1207_v2 = vpop.eup %1206  ;;  %903 = vst [vmem:[#allocation15 + $0x8] sm:$0xff] %v1205_v63 }
 0x332   :  { %905 = vst [vmem:[#allocation15 + $0x18] sm:$0xff] %v1207_v2  ;;  %v806_v3 = vpop.f32.mrb[8].mxu0  ;;  %v847_v4 = vpop.f32.mrb[8].mxu1 }
 0x333   :  { %v807_v5 = vadd.f32 %v806_v3, %v386_v61  ;;  %v848_v6 = vadd.f32 %v847_v4, %v394_v62  ;;  %v808_v7 = vpop.f32.mrb[9].mxu0  ;;  %v1084_v8 = vpop.f32.mrb[9].mxu1 }
 0x334   :  { %v809_v9 = vadd.f32 %v808_v7, %v390_v1  ;;  %v810_v10 = vpop.f32.mrb[10].mxu0  ;;  %v850_v11 = vpop.f32.mrb[10].mxu1 }
 0x335   :  { %857 = vst [vmem:[#allocation14 + $0x20] sm:$0xff] %v807_v5  ;;  %v1014_v12 = vmul.f32 -1.442695, %v807_v5  ;;  %859 = vst [vmem:[#allocation14 + $0x30] sm:$0xff] %v848_v6  ;;  %v1016_v13 = vmul.f32 -1.442695, %v848_v6 }
 0x336   :  { %v811_v14 = vpop.f32.mrb[11].mxu0  ;;  %v1085_v15 = vpop.f32.mrb[11].mxu1  ;;  %858 = vst [vmem:[#allocation14 + $0x28] sm:$0xff] %v809_v9  ;;  %v1015_v16 = vmul.f32 -1.442695, %v809_v9 }
 0x337   :  { %1208 = vpow2.f32 %v1014_v12 }
 0x338   :  { %1385 = shalt.err (!%p1382_p4)
}
 0x339   :  { %s1386_s23 = scalar_lea.hbm %s1630_s7, 896 }
 0x33a   :  { %p1387_p5 = scmp.ne.s32.totalorder %s1630_s7, %s1386_s23  ;;  %p1390_p6 = scmp.lt.u32.totalorder %s1386_s23, %s1630_s7 }
 0x33c   :  { %p1392_p7 = pnand %p1390_p6, %p1387_p5 }
 0x33e   :  { %1395 = shalt.err (!%p1392_p7)
}
 0x33f   :  { %918 = dma.vmem_to_hbm [thread:$0]  %s916_s0, 896, %s1630_s7, [#allocation4]   ;;  %1210 = vpow2.f32 %v1016_v13 }
 0x340   :  { %1212 = vpow2.f32 %v1015_v16  ;;  %s1445_s28 = smov [#allocation15]  }
 0x341   :  { %v1209_v17 = vpop.eup %1208  ;;  %s925_s9 = sshll.u32 %s1445_s28, 4  ;;  %s926_s9 = int_to_ptr.vmem [resolvable:$true] %s925_s9 }
 0x342   :  { %v885_v19 = vadd.f32 1.0, %v1209_v17  ;;  %s1396_s7 = scalar_lea.vmem %s926_s9, 896  ;;  %p1401_p9 = scmp.lt.s32.totalorder %s926_s9, %s926_s9 }
 0x343   :  { %p1397_p8 = scmp.ne.s32.totalorder %s926_s9, %s1396_s7  ;;  %p1402_p10 = scmp.lt.s32.totalorder %s1396_s7, %s1396_s7 }
 0x344   :  { %1214 = vrcp.f32 %v885_v19 }
 0x345   :  { %p1403_p11 = por %p1402_p10, %p1401_p9 }
 0x347   :  { %p1404_p12 = pnand %p1403_p11, %p1397_p8 }
 0x349   :  { %v1211_v18 = vpop.eup %1210 }
 0x34a   :  { %v1213_v20 = vpop.eup %1212  ;;  %v887_v21 = vadd.f32 1.0, %v1211_v18 }
 0x34b   :  { %v886_v22 = vadd.f32 1.0, %v1213_v20 }
 0x34c   :  { %1216 = vrcp.f32 %v887_v21 }
 0x34d   :  { %1218 = vrcp.f32 %v886_v22 }
 0x34e   :  { %v1215_v23 = vpop.eup %1214 }
 0x34f   :  { %906 = vst [vmem:[#allocation15 + $0x20] sm:$0xff] %v1215_v23 }
 0x356   :  { %v1217_v24 = vpop.eup %1216 }
 0x357   :  { %v1219_v25 = vpop.eup %1218  ;;  %908 = vst [vmem:[#allocation15 + $0x30] sm:$0xff] %v1217_v24 }
 0x358   :  { %907 = vst [vmem:[#allocation15 + $0x28] sm:$0xff] %v1219_v25 }
 0x359   :  { %1407 = shalt.err (!%p1404_p12)
}
 0x35a   :  { %s1408_s5 = scalar_lea.hbm %s1631_s8, 896 }
 0x35b   :  { %p1409_p13 = scmp.ne.s32.totalorder %s1631_s8, %s1408_s5  ;;  %p1412_p0 = scmp.lt.u32.totalorder %s1408_s5, %s1631_s8 }
 0x35d   :  { %p1414_p1 = pnand %p1412_p0, %p1409_p13 }
 0x35f   :  { %1417 = shalt.err (!%p1414_p1)
}
 0x360   :  { %928 = dma.vmem_to_hbm [thread:$0]  %s926_s9, 896, %s1631_s8, [#allocation16]  }
 0x361   :  { %1426 = dma.done.wait [#allocation4], 896  }
 0x362   :  { %1427 = vsyncadd [#allocation4], 4294966400 }
 0x363   :  { %1428 = dma.done.wait [#allocation16], 896  }
 0x364   :  { %1429 = vsyncadd [#allocation16], 4294966400 }
 0x365   :  { %935 = vsyncpa [#allocation3], 1 }
 0x366   :  { %936 = vsyncpa [#allocation6], 1 }
 0x367   :  { %937 = vsyncpa [#allocation9], 1 }
 0x368   :  { %938 = vsyncpa [#allocation12], 1 }
 0x369   :  { %939 = vsyncpa [#allocation4], 1 }
 0x36a   :  { %940 = vsyncpa [#allocation16], 1 }

</bundles_post_ra>
